<compile_context>
chip_gen: v7x
topology: tpu7x:2x2x1
jax: 0.10.0
libtpu: 0.0.40
codegen_flags: <defaults>
</compile_context>

<pallas_src>
import functools

import jax
import jax.numpy as jnp
from jax import lax
from jax.experimental import pallas as pl
from jax.experimental.pallas import tpu as pltpu

LEAKY_SLOPE = 0.2
BN_EPS = 1e-5


def _conv_window(x_ref, w_ref, tap_offsets, lw):
    """3x3 conv for one batch element as a single MXU matmul.

    x_ref: (1, Cin, Lp)   zero-padded bf16 input, spatial flattened
    w_ref: (Cout, 9*Cin)  bf16 conv weight, K index = (ky*3+kx)*Cin + ci
    Returns (Cout, lw) f32 conv values over the flat window; window position
    p = h*(W+2) + w holds output pixel (h, w) (columns with w >= W are junk
    and are masked / sliced away downstream).
    """
    x = x_ref[0]                                           # (Cin, Lp) bf16
    taps = [x[:, off:off + lw] for off in tap_offsets]     # 9 x (Cin, lw)
    xcat = jnp.concatenate(taps, axis=0)                   # (9*Cin, lw) bf16
    return jnp.dot(w_ref[...], xcat, preferred_element_type=jnp.float32)


def _stats_kernel(x_ref, w_ref, mask_ref, stats_ref, *, tap_offsets, lw):
    """Pass 1: conv + masked per-channel sum / sum-of-squares for one image."""
    conv = _conv_window(x_ref, w_ref, tap_offsets, lw)     # (Cout, lw) f32
    m = mask_ref[...]                                      # (1, lw) f32
    cm = conv * m
    s = jnp.sum(cm, axis=1, keepdims=True)                 # (Cout, 1)
    ss = jnp.sum(cm * conv, axis=1, keepdims=True)         # (Cout, 1)
    stats_ref[0] = jnp.concatenate([s, ss], axis=1)        # (Cout, 2)


def _norm_kernel(x_ref, w_ref, stats_ref, gamma_ref, beta_ref, o_ref, *,
                 tap_offsets, lw, inv_count):
    """Pass 2: recompute conv, fold BN (from batch stats) + LeakyReLU, store lane-dense."""
    conv = _conv_window(x_ref, w_ref, tap_offsets, lw)     # (Cout, lw) f32

    # Fold batch stats -> per-channel affine (tiny; recomputed per grid step).
    tot = jnp.sum(stats_ref[...], axis=0)                  # (Cout, 2)
    mean = tot[:, 0:1] * inv_count                         # (Cout, 1)
    var = tot[:, 1:2] * inv_count - mean * mean            # biased var (BN train mode)
    scale = gamma_ref[...] * lax.rsqrt(var + BN_EPS)       # (Cout, 1)
    shift = beta_ref[...] - mean * scale                   # (Cout, 1)

    y = conv * scale + shift
    o_ref[0] = jnp.where(y >= 0, y, LEAKY_SLOPE * y)       # LeakyReLU(0.2)


def upsampling_forward(x_nchw, w_oihw, gamma, beta):
    """Equivalent of UpSampling(in_ch, out_ch)(x) for a freshly constructed module."""
    N, Cin, H, W = x_nchw.shape
    Cout = w_oihw.shape[0]
    Wp = W + 2
    Lwin = H * Wp                 # flat window: position p = h*Wp + w
    Lp = (H + 3) * Wp             # 1 top + H real + 2 bottom padded rows (flat)
    tap_offsets = tuple(dy * Wp + dx for dy in range(3) for dx in range(3))

    # glue: zero-pad spatially (extra bottom row keeps all window reads in
    # bounds), cast to bf16 once, flatten spatial to the lane dimension.
    xp = jnp.pad(x_nchw, ((0, 0), (0, 0), (1, 2), (1, 1))).astype(jnp.bfloat16)
    xpf = xp.reshape(N, Cin, Lp)

    # weight (Cout, Cin, 3, 3) -> (Cout, 9*Cin), bf16 for native-rate MXU.
    w2 = jnp.transpose(w_oihw, (0, 2, 3, 1)).reshape(Cout, 9 * Cin).astype(jnp.bfloat16)

    # validity mask over the window: column index within a padded row < W.
    mask = (jnp.arange(Lwin) % Wp < W).astype(jnp.float32).reshape(1, Lwin)

    grid = (N,)
    cparams = pltpu.CompilerParams(dimension_semantics=("parallel",))

    # ---- pass 1: per-image conv + masked per-channel sum / sumsq ----
    stats = pl.pallas_call(
        functools.partial(_stats_kernel, tap_offsets=tap_offsets, lw=Lwin),
        out_shape=jax.ShapeDtypeStruct((N, Cout, 2), jnp.float32),
        grid=grid,
        in_specs=[pl.BlockSpec((1, Cin, Lp), lambda n: (n, 0, 0)),
                  pl.BlockSpec((Cout, 9 * Cin), lambda n: (0, 0)),
                  pl.BlockSpec((1, Lwin), lambda n: (0, 0))],
        out_specs=pl.BlockSpec((1, Cout, 2), lambda n: (n, 0, 0)),
        compiler_params=cparams,
    )(xpf, w2, mask)

    # ---- pass 2: recompute conv, fold BN affine in-kernel, LeakyReLU ----
    g2 = gamma.astype(jnp.float32).reshape(Cout, 1)
    b2 = beta.astype(jnp.float32).reshape(Cout, 1)
    inv_count = 1.0 / float(N * H * W)

    yw = pl.pallas_call(
        functools.partial(_norm_kernel, tap_offsets=tap_offsets, lw=Lwin,
                          inv_count=inv_count),
        out_shape=jax.ShapeDtypeStruct((N, Cout, Lwin), jnp.float32),
        grid=grid,
        in_specs=[pl.BlockSpec((1, Cin, Lp), lambda n: (n, 0, 0)),
                  pl.BlockSpec((Cout, 9 * Cin), lambda n: (0, 0)),
                  pl.BlockSpec((N, Cout, 2), lambda n: (0, 0, 0)),
                  pl.BlockSpec((Cout, 1), lambda n: (0, 0)),
                  pl.BlockSpec((Cout, 1), lambda n: (0, 0))],
        out_specs=pl.BlockSpec((1, Cout, Lwin), lambda n: (n, 0, 0)),
        compiler_params=cparams,
    )(xpf, w2, stats, g2, b2)

    # ---- glue: drop padded columns, 2x nearest upsample (pure layout ops) ----
    y = yw.reshape(N, Cout, H, Wp)[:, :, :, :W]             # (N, Cout, H, W)
    up = jnp.broadcast_to(y[:, :, :, None, :, None], (N, Cout, H, 2, W, 2))
    return up.reshape(N, Cout, 2 * H, 2 * W)


def _reference(x_nchw, w_oihw, gamma, beta):
    """Pure-JAX reference mirroring the PyTorch forward (training-mode BN)."""
    conv = lax.conv_general_dilated(
        x_nchw, w_oihw, window_strides=(1, 1), padding=((1, 1), (1, 1)),
        dimension_numbers=("NCHW", "OIHW", "NCHW"),
        precision=lax.Precision.HIGHEST)
    mean = conv.mean(axis=(0, 2, 3), keepdims=True)
    var = ((conv - mean) ** 2).mean(axis=(0, 2, 3), keepdims=True)
    y = (conv - mean) * lax.rsqrt(var + BN_EPS)
    y = y * gamma.reshape(1, -1, 1, 1) + beta.reshape(1, -1, 1, 1)
    y = jnp.where(y >= 0, y, LEAKY_SLOPE * y)
    return jnp.repeat(jnp.repeat(y, 2, axis=2), 2, axis=3)


if __name__ == "__main__":
    key = jax.random.PRNGKey(0)
    kx, kw = jax.random.split(key)

    N, Cin, Cout, H, W = 2, 4, 8, 16, 16
    x = jax.random.normal(kx, (N, Cin, H, W), jnp.float32)

    # Deterministic parameter init matching the module's __init__:
    fan_in = Cin * 3 * 3
    w = jax.random.normal(kw, (Cout, Cin, 3, 3), jnp.float32) * jnp.sqrt(2.0 / fan_in)  # kaiming_normal_
    gamma = jnp.ones((Cout,), jnp.float32)   # nn.BatchNorm2d default weight
    beta = jnp.zeros((Cout,), jnp.float32)   # nn.BatchNorm2d default bias

    out = jax.block_until_ready(upsampling_forward(x, w, gamma, beta))
    ref = jax.block_until_ready(_reference(x, w, gamma, beta))

    assert out.shape == (N, Cout, 2 * H, 2 * W), out.shape
    max_err = float(jnp.max(jnp.abs(out - ref)))
    # bf16 MXU inputs with f32 accumulation: expected |err| ~ 1e-2 after BN
    # normalization vs. the HIGHEST-precision reference.
    assert max_err < 3e-2, f"max_err={max_err}"
    print("KERNEL_OK")

    # TODO(synk): BatchNorm2d running_mean/running_var buffer updates (a
    # training-time side effect) are not modeled; only the forward output is.
</pallas_src>

<mosaic_0001>
module attributes {stable_mosaic.version = 11 : i64} {
  func.func @_stats_kernel(%arg0: i32, %arg1: memref<1x4x342xbf16, #tpu.memory_space<vmem>>, %arg2: memref<8x36xbf16, #tpu.memory_space<vmem>>, %arg3: memref<1x288xf32, #tpu.memory_space<vmem>>, %arg4: memref<1x8x2xf32, #tpu.memory_space<vmem>>) attributes {dimension_semantics = [#tpu.dimension_semantics<parallel>], iteration_bounds = array<i64: 2>, scalar_prefetch = 0 : i64, scratch_operands = 0 : i64, tpu.core_type = #tpu.core_type<tc>, window_params = [{transform_indices = @transform_0, window_bounds = array<i64: 1, 4, 342>}, {pipeline_mode = #tpu.pipeline_mode<synchronous>, transform_indices = @transform_1, window_bounds = array<i64: 8, 36>}, {pipeline_mode = #tpu.pipeline_mode<synchronous>, transform_indices = @transform_2, window_bounds = array<i64: 1, 288>}, {transform_indices = @transform_3, window_bounds = array<i64: 1, 8, 2>}]} {
    %c0 = arith.constant 0 : index
    %c0_0 = arith.constant 0 : index
    %c0_1 = arith.constant 0 : index
    %0 = vector.load %arg1[%c0, %c0_0, %c0_1] : memref<1x4x342xbf16, #tpu.memory_space<vmem>>, vector<1x4x342xbf16>
    %1 = vector.shape_cast %0 : vector<1x4x342xbf16> to vector<4x342xbf16>
    %2 = vector.extract_strided_slice %1 {offsets = [0, 0], sizes = [4, 288], strides = [1, 1]} : vector<4x342xbf16> to vector<4x288xbf16>
    %3 = vector.extract_strided_slice %1 {offsets = [0, 1], sizes = [4, 288], strides = [1, 1]} : vector<4x342xbf16> to vector<4x288xbf16>
    %4 = vector.extract_strided_slice %1 {offsets = [0, 2], sizes = [4, 288], strides = [1, 1]} : vector<4x342xbf16> to vector<4x288xbf16>
    %5 = vector.extract_strided_slice %1 {offsets = [0, 18], sizes = [4, 288], strides = [1, 1]} : vector<4x342xbf16> to vector<4x288xbf16>
    %6 = vector.extract_strided_slice %1 {offsets = [0, 19], sizes = [4, 288], strides = [1, 1]} : vector<4x342xbf16> to vector<4x288xbf16>
    %7 = vector.extract_strided_slice %1 {offsets = [0, 20], sizes = [4, 288], strides = [1, 1]} : vector<4x342xbf16> to vector<4x288xbf16>
    %8 = vector.extract_strided_slice %1 {offsets = [0, 36], sizes = [4, 288], strides = [1, 1]} : vector<4x342xbf16> to vector<4x288xbf16>
    %9 = vector.extract_strided_slice %1 {offsets = [0, 37], sizes = [4, 288], strides = [1, 1]} : vector<4x342xbf16> to vector<4x288xbf16>
    %10 = vector.extract_strided_slice %1 {offsets = [0, 38], sizes = [4, 288], strides = [1, 1]} : vector<4x342xbf16> to vector<4x288xbf16>
    %11 = tpu.concatenate %2, %3, %4, %5, %6, %7, %8, %9, %10 in 0 : vector<4x288xbf16>, vector<4x288xbf16>, vector<4x288xbf16>, vector<4x288xbf16>, vector<4x288xbf16>, vector<4x288xbf16>, vector<4x288xbf16>, vector<4x288xbf16>, vector<4x288xbf16> -> vector<36x288xbf16>
    %c0_2 = arith.constant 0 : index
    %c0_3 = arith.constant 0 : index
    %12 = vector.load %arg2[%c0_2, %c0_3] : memref<8x36xbf16, #tpu.memory_space<vmem>>, vector<8x36xbf16>
    %cst = arith.constant dense<0.000000e+00> : vector<8x288xf32>
    %13 = tpu.matmul %12, %11, %cst {dimension_numbers = #tpu.dot_dimension_numbers<[1], [0], [0], [1], [0, 0, 1, 1], [], []>} : vector<8x36xbf16>, vector<36x288xbf16>, vector<8x288xf32> -> vector<8x288xf32>
    %c0_4 = arith.constant 0 : index
    %c0_5 = arith.constant 0 : index
    %14 = vector.load %arg3[%c0_4, %c0_5] : memref<1x288xf32, #tpu.memory_space<vmem>>, vector<1x288xf32>
    %15 = vector.broadcast %14 : vector<1x288xf32> to vector<8x288xf32>
    %16 = arith.mulf %13, %15 : vector<8x288xf32>
    %cst_6 = arith.constant dense<0.000000e+00> : vector<8xf32>
    %17 = vector.multi_reduction <add>, %16, %cst_6 [1] : vector<8x288xf32> to vector<8xf32>
    %18 = vector.shape_cast %17 : vector<8xf32> to vector<8x1xf32>
    %19 = arith.mulf %16, %13 : vector<8x288xf32>
    %cst_7 = arith.constant dense<0.000000e+00> : vector<8xf32>
    %20 = vector.multi_reduction <add>, %19, %cst_7 [1] : vector<8x288xf32> to vector<8xf32>
    %21 = vector.shape_cast %20 : vector<8xf32> to vector<8x1xf32>
    %22 = tpu.concatenate %18, %21 in 1 : vector<8x1xf32>, vector<8x1xf32> -> vector<8x2xf32>
    %c0_8 = arith.constant 0 : index
    %c0_9 = arith.constant 0 : index
    %c0_10 = arith.constant 0 : index
    %23 = vector.load %arg4[%c0_8, %c0_9, %c0_10] : memref<1x8x2xf32, #tpu.memory_space<vmem>>, vector<1x8x2xf32>
    %24 = vector.shape_cast %23 : vector<1x8x2xf32> to vector<8x2xf32>
    %25 = vector.shape_cast %22 : vector<8x2xf32> to vector<1x8x2xf32>
    tpu.vector_store %arg4[%c0_8, %c0_9, %c0_10], %25 {strides = array<i32>} : memref<1x8x2xf32, #tpu.memory_space<vmem>>, vector<1x8x2xf32>,
    return
  }
  func.func @transform_0(%arg0: i32) -> (i32, i32, i32) {
    %c0_i32 = arith.constant 0 : i32
    %c0_i32_0 = arith.constant 0 : i32
    %c0_i32_1 = arith.constant 0 : i32
    return %arg0, %c0_i32, %c0_i32_0 : i32, i32, i32
  }
  func.func @transform_1(%arg0: i32) -> (i32, i32) {
    %c0_i32 = arith.constant 0 : i32
    %c0_i32_0 = arith.constant 0 : i32
    %c0_i32_1 = arith.constant 0 : i32
    return %c0_i32, %c0_i32_0 : i32, i32
  }
  func.func @transform_2(%arg0: i32) -> (i32, i32) {
    %c0_i32 = arith.constant 0 : i32
    %c0_i32_0 = arith.constant 0 : i32
    %c0_i32_1 = arith.constant 0 : i32
    return %c0_i32, %c0_i32_0 : i32, i32
  }
  func.func @transform_3(%arg0: i32) -> (i32, i32, i32) {
    %c0_i32 = arith.constant 0 : i32
    %c0_i32_0 = arith.constant 0 : i32
    %c0_i32_1 = arith.constant 0 : i32
    return %arg0, %c0_i32, %c0_i32_0 : i32, i32, i32
  }
}

</mosaic_0001>

<bundles_post_ra>
// kernel: tpu_custom_call.1
= control target key start
LH: loop header
LB: loop body
LE: loop exit
PB: predicated region body
PF: predicated region fallthrough
CT: control target
= control target key end

     0   :  { %8 = vsyncpa [#allocation3], 0  ;;  %s991_s0 = inlined_call_operand.hbm [shape: bf16[2,4,342], index: 0, kind: input, shape index: {}]   ;;  %s992_s1 = inlined_call_operand.hbm [shape: bf16[8,36], index: 1, kind: input, shape index: {}]   ;;  %s993_s2 = inlined_call_operand.vmem [shape: f32[1,288], index: 2, kind: input, shape index: {}]   ;;  %s994_s3 = inlined_call_operand.vmem [shape: f32[2,8,2], index: 3, kind: output, shape index: {}]  }
   0x1   :  { %10 = vsyncpa [#allocation3 + $0x1], 0 }
   0x2   :  { %11 = vsyncpa [#allocation5], 0  ;;  %s788_s12 = smov 0   ;;  %s790_s13 = smov 0  }
   0x3   :  { %s792_s14 = smov 0   ;;  %s794_s15 = smov 0  }
   0x4 LB: > { %s807_s16 = sadd.s32 4294967295, %s752_s15   ;;  %p37_p0 = scmp.ne.s32.totalorder %s744_s13, %s740_s12  ;;  %s752_s15 = sphi %s794_s15, %s1012_s15   ;;  %s748_s14 = sphi %s792_s14, %s1011_s14   ;;  %s744_s13 = sphi %s790_s13, %s1010_s13   ;;  %s740_s12 = sphi %s788_s12, %s1009_s12  }
   0x5   : > { %p995_p1 = scmp.eq.s32.totalorder %s807_s16, 0  ;;  %p563_p2 = scmp.ge.s32.totalorder %s752_s15, 1 }
   0x6   : > { %p116_p3 = scmp.lt.s32.totalorder %s752_s15, 3  ;;  %s754_s19 = smov [#allocation4]  }
   0x7   : > { %p815_p4 = por %p995_p1, %p37_p0  ;;  %s129_s20 = sshll.u32 %s754_s19, 4  ;;  %s130_s20 = int_to_ptr.vmem [resolvable:$true] %s129_s20 }
   0x8   : > { %p819_p5 = pnand %p563_p2, %p116_p3  ;;  %s826_s21 = sadd.s32 1, %s752_s15  }
   0x9   : > { %s998_s17 = scalar_select %p815_p4, 1, 0 }
   0xa   : > { %s999_s18 = scalar_select %p819_p5, 1, 0 }
   0xb   : > { %p598_p6 = pneg %p819_p5  ;;  %s21_s23 = ssub.s32 %s752_s15, %s826_s21 }
   0xc   : > { %p836_p8 = scmp.eq.s32.totalorder %s21_s23, 0  ;;  %s24_s25 = sadd.s32 1, %s748_s14 }
   0xd   : > { %p830_p7 = pnand %p598_p6, %p995_p1  ;;  %s656_s28 = scalar_lea.hbm %s992_s1, 64 }
   0xe   : > { %s1001_s24 = scalar_select %p836_p8, 1, 0 }
   0xf   : > { %p657_p10 = scmp.ne.s32.totalorder %s992_s1, %s656_s28  ;;  %p658_p11 = pneg %p830_p7 }
  0x10   : > { %p663_p0 = scmp.lt.u32.totalorder %s656_s28, %s992_s1 }
  0x11   : > { %p659_p12 = pnand %p658_p11, %p657_p10 }
  0x13   : > { %p660_p13 = pneg %p659_p12 }
  0x15   : > { %p665_p2 = pnand %p663_p0, %p660_p13 }
  0x17   : > { %668 = shalt.err (!%p665_p2)
}
  0x18   : > { %s669_s6 = scalar_lea.vmem %s130_s20, 64  ;;  %p677_p9 = scmp.lt.s32.totalorder %s130_s20, %s130_s20 }
  0x19   : > { %p670_p3 = scmp.ne.s32.totalorder %s130_s20, %s669_s6  ;;  %p678_p4 = scmp.lt.s32.totalorder %s669_s6, %s669_s6 }
  0x1b   : > { %p672_p6 = pnand %p670_p3, %p658_p11  ;;  %p679_p5 = por %p678_p4, %p677_p9 }
  0x1d   : > { %p673_p1 = pneg %p672_p6 }
  0x1f   : > { %p680_p8 = pnand %p679_p5, %p673_p1 }
  0x21   : > { %683 = shalt.err (!%p680_p8)
}
  0x22   : > { %601 = dma.hbm_to_vmem [thread:$0]  (!%p830_p7), %s992_s1, 64, %s130_s20, [#allocation5]  }
  0x23   : > { %p1002_p10 = scmp.ne.s32.totalorder %s1001_s24, 0  ;;  %p32_p4 = scmp.eq.s32.totalorder %s752_s15, 0 }
  0x24   : > { %p607_p1 = scmp.lt.s32.totalorder %s752_s15, 2  ;;  %s143_s10 = sand.u32 1, %s748_s14  }
  0x25   : > { %s862_s9 = scalar_select %p1002_p10, %s748_s14, %s24_s25  }
  0x26   : > { %s590_s11 = smul.u32 96, %s752_s15  ;;  %p1003_p5 = scmp.ne.s32.totalorder %s748_s14, %s744_s13 }
  0x27   : > { %s589_s12 = smul.u32 6, %s143_s10  ;;  %s144_s25 = scalar_lea.sflag [#allocation3], %s143_s10 }
  0x28   : > { %p33_p8 = por %p32_p4, %p1003_p5  ;;  %s878_s20 = scalar_lea.hbm %s991_s0, %s590_s11 }
  0x29   : > { %s147_s24 = scalar_lea.vmem [#allocation2], %s589_s12  ;;  %s684_s26 = scalar_lea.hbm %s878_s20, 96 }
  0x2a   : > { %p871_p9 = pnand %p607_p1, %p33_p8  ;;  %s155_s15 = sshll.u32 %s147_s24, 4  ;;  %s880_s15 = int_to_ptr.vmem [resolvable:$true] %s155_s15 }
  0x2b   : > { %p685_p7 = scmp.ne.s32.totalorder %s878_s20, %s684_s26  ;;  %s689_s29 = scalar_lea.hbm %s991_s0, 192 }
  0x2c   : > { %p686_p11 = pneg %p871_p9  ;;  %p690_p0 = scmp.lt.u32.totalorder %s878_s20, %s991_s0 }
  0x2d   : > { %p691_p2 = scmp.lt.u32.totalorder %s689_s29, %s684_s26  ;;  %p693_p6 = scmp.lt.u32.totalorder %s684_s26, %s878_s20 }
  0x2e   : > { %p687_p12 = pnand %p686_p11, %p685_p7 }
  0x2f   : > { %p692_p3 = por %p691_p2, %p690_p0 }
  0x30   : > { %p688_p13 = pneg %p687_p12 }
  0x31   : > { %p694_p10 = por %p693_p6, %p692_p3 }
  0x33   : > { %p695_p4 = pnand %p694_p10, %p688_p13 }
  0x35   : > { %698 = shalt.err (!%p695_p4)
}
  0x36   : > { %s699_s5 = scalar_lea.vmem %s880_s15, 96  ;;  %s755_s6 = smov [#allocation2]  }
  0x37   : > { %p700_p1 = scmp.ne.s32.totalorder %s880_s15, %s699_s5  ;;  %s704_s7 = sshll.u32 %s755_s6, 4  ;;  %s705_s7 = int_to_ptr.vmem [resolvable:$false] %s704_s7 }
  0x38   : > { %s706_s8 = scalar_lea.vmem %s705_s7, 192  ;;  %p707_p7 = scmp.lt.s32.totalorder %s880_s15, %s705_s7 }
  0x39   : > { %p702_p5 = pnand %p700_p1, %p686_p11  ;;  %p708_p12 = scmp.lt.s32.totalorder %s706_s8, %s699_s5 }
  0x3b   : > { %p703_p8 = pneg %p702_p5  ;;  %p709_p0 = por %p708_p12, %p707_p7 }
  0x3d   : > { %p710_p2 = pnand %p709_p0, %p703_p8 }
  0x3f   : > { %713 = shalt.err (!%p710_p2)
}
  0x40   : > { %605 = dma.hbm_to_vmem [thread:$0]  (!%p871_p9), %s878_s20, 96, %s880_s15, %s144_s25  }
  0x41   : > { %p1005_p13 = scmp.ne.s32.totalorder %s999_s18, 0 }
  0x42   : > { %s166_s10 = sand.u32 (!%p1005_p13), 1, %s744_s13   ;;  %p1006_p11 = scmp.ne.s32.totalorder (!%p1005_p13), %s998_s17, 0 }
  0x43   : > { %164 = sbr.rel (%p1005_p13) target bundleno = 616 (0x268), region = 32  ;;  %s167_s12 = scalar_lea.sflag (!%p1005_p13), [#allocation3], %s166_s10 }
  0x44   : > { %s591_s11 = smul.u32 (!%p1005_p13), 6, %s166_s10 }
  0x46   : > { %s170_s22 = scalar_lea.vmem (!%p1005_p13), [#allocation2], %s591_s11 }
  0x4a   : > { %731 = dma.done.wait (%p1006_p11), %s167_s12, 96  }
  0x4b   : > { %733 = vsyncadd (%p1006_p11), %s167_s12, 4294967200  ;;  %p1007_p3 = scmp.eq.s32.totalorder %s807_s16, 0 }
  0x4d   : > { %735 = dma.done.wait (%p1007_p3), [#allocation5], 64   ;;  %p1008_p6 = pmov %p1007_p3 }
  0x4e   : > { %v207_v0 = vlaneseq  ;;  %v756_v1 = vmov 1983009808   ;;  %v201_v6 = vld [vmem:[%s170_s22] sm:$0x3f]  ;;  %s757_s17 = smov 126   ;;  %s758_s18 = smov 127  }
  0x4f   : > { %737 = vsyncadd (%p1008_p6), [#allocation5], 4294967232  ;;  %v205_v2 = vunpack.c.l.s4 %v756_v1  ;;  %v219_v8 = vcombine.low %v201_v6, %v201_v6  ;;  %v203_v10 = vcombine.high %v201_v6, %v201_v6  ;;  %v759_v11 = vmov 0.0   ;;  %s760_s19 = smov 110   ;;  %s761_s23 = smov 109  }
  0x50   : > { %v918_v3 = vshrl.u32 %v207_v0, 7  ;;  %579 = vmatprep.subr.bf16.mxu1 %v759_v11  ;;  %s762_s20 = smov 108   ;;  %s763_s24 = smov 92   ;;  %vm764_vm0 = vmmov 0   ;;  %v765_v18 = vmov 0   ;;  %vm234_vm1 = vcmask 1039360  }
  0x51   : > { %v206_v4 = vunpack.c.0.s8 %v205_v2  ;;  %585 = vmatprep.mubr.msk.bf16.mxu1 %vm764_vm0, %v759_v11  ;;  %400 = vmatprep.mubr.bf16.mxu0 %v765_v18  ;;  %s766_s15 = smov 91   ;;  %s767_s25 = smov 90   ;;  %vm303_vm2 = vcmask 1041408   ;;  %vm255_vm3 = vcmask 900096   ;;  %vm245_vm4 = vcmask 1031168  }
  0x52   : > { %vm320_vm5 = vcmask 1045504   ;;  %vm313_vm6 = vcmask 1043456   ;;  %vm273_vm7 = vcmask 883712   ;;  %vm282_vm8 = vcmask 752640   ;;  %v449_v18 = vld [vmem:[%s993_s2] sm:$0x7] }
  0x53   : > { %v209_v5 = vsub.s32 %v206_v4, %v918_v3  ;;  %vm264_vm9 = vcmask 891904   ;;  %vm291_vm10 = vcmask 744448   ;;  %vm300_vm11 = vcmask 736256   ;;  %p196_p9 = scmp.lt.s32.totalorder %s807_s16, 1 }
  0x54   : > { %vm355_vm12 = vcmask 293888   ;;  %vm470_vm13 = vcmask 261120   ;;  %vm483_vm14 = vcmask 7168   ;;  %vm485_vm15 = vcmask 15360  }
  0x55   : > { %v921_v7 = vrot.slane %v201_v6, %v209_v5  ;;  %v226_v9 = vrot.slane %v219_v8, %v209_v5  ;;  %v217_v14 = vrot.slane %v203_v10, %v209_v5  ;;  %s1014_s16 = smov (!%p196_p9, %s807_s16), 1 }
  0x56   : > { %s569_s28 = sshll.u32 %s1014_s16, 3 }
  0x57   : > { %241 = vrot.lane.b32.xlu1 %v921_v7, %s757_s17  ;;  %232 = vrot.lane.b32.xlu0 %v921_v7, %s758_s18  ;;  %v227_v12 = vcombine.high %v226_v9, %v226_v9  ;;  %v237_v13 = vcombine.low %v921_v7, %v921_v7  ;;  %v238_v15 = vcombine.low %v217_v14, %v217_v14  ;;  %s199_s4 = scalar_lea.vmem %s994_s3, %s569_s28 }
  0x58   : > { %v218_v16 = vcombine.high %v921_v7, %v921_v7  ;;  %v248_v17 = vcombine.low %v226_v9, %v226_v9 }
  0x5b   : > { %228 = vrot.lane.b32.xlu1 %v226_v9, %s758_s18  ;;  %251 = vrot.lane.b32.xlu0 %v226_v9, %s760_s19 }
  0x5f   : > { %230 = vrot.lane.b32.xlu0 %v227_v12, %s758_s18  ;;  %239 = vrot.lane.b32.xlu1 %v237_v13, %s757_s17 }
  0x63   : > { %253 = vrot.lane.b32.xlu1 %v237_v13, %s760_s19  ;;  %243 = vrot.lane.b32.xlu0 %v238_v15, %s757_s17 }
  0x67   : > { %260 = vrot.lane.b32.xlu1 %v218_v16, %s761_s23  ;;  %249 = vrot.lane.b32.xlu0 %v248_v17, %s760_s19 }
  0x6b   : > { %269 = vrot.lane.b32.xlu1 %v227_v12, %s762_s20  ;;  %262 = vrot.lane.b32.xlu0 %v217_v14, %s761_s23 }
  0x6f   : > { %258 = vrot.lane.b32.xlu1 %v921_v7, %s761_s23  ;;  %271 = vrot.lane.b32.xlu0 %v921_v7, %s762_s20 }
  0x73   : > { %278 = vrot.lane.b32.xlu1 %v921_v7, %s763_s24  ;;  %267 = vrot.lane.b32.xlu0 %v226_v9, %s762_s20 }
  0x77   : > { %276 = vrot.lane.b32.xlu1 %v237_v13, %s763_s24  ;;  %280 = vrot.lane.b32.xlu0 %v238_v15, %s763_s24 }
  0x7b   : > { %289 = vrot.lane.b32.xlu1 %v237_v13, %s766_s15  ;;  %287 = vrot.lane.b32.xlu0 %v226_v9, %s766_s15 }
  0x7f   : > { %294 = vrot.lane.b32.xlu1 %v921_v7, %s767_s25  ;;  %285 = vrot.lane.b32.xlu0 %v248_v17, %s766_s15  ;;  %v461_v17 = vsub.s32 2, %v918_v3 }
  0x83   : > { %298 = vrot.lane.b32.xlu1 %v217_v14, %s767_s25  ;;  %296 = vrot.lane.b32.xlu0 %v218_v16, %s767_s25 }
  0xc9   : > { %v242_v19 = vpop.permute.xlu1 %241  ;;  %v233_v20 = vpop.permute.xlu0 %232 }
  0xca   : > { %v312_v27 = vsel %vm303_vm2, %v217_v14, %v233_v20 }
  0xcd   : > { %v229_v21 = vpop.permute.xlu1 %228  ;;  %v252_v22 = vpop.permute.xlu0 %251 }
  0xd1   : > { %v231_v23 = vpop.permute.xlu0 %230  ;;  %v240_v24 = vpop.permute.xlu1 %239 }
  0xd2   : > { %v236_v25 = vsel %vm234_vm1, %v231_v23, %v233_v20  ;;  %v235_v26 = vsel %vm234_vm1, %v229_v21, %v231_v23  ;;  %v246_v35 = vsel %vm245_vm4, %v240_v24, %v242_v19  ;;  %v457_v20 = vsub.s32 1, %v918_v3 }
  0xd3   : > { %v309_v30 = vsel %vm303_vm2, %v218_v16, %v236_v25  ;;  %v306_v34 = vsel %vm303_vm2, %v921_v7, %v235_v26  ;;  %v354_v16 = vld [vmem:[#allocation4] sm:$0xf]  ;;  %v462_v21 = vrot.slane %v449_v18, %v461_v17 }
  0xd4   : > { %v315_v42 = vsel %vm313_vm6, %v306_v34, %v246_v35  ;;  %v458_v23 = vrot.slane %v449_v18, %v457_v20 }
  0xd5   : > { %v254_v28 = vpop.permute.xlu1 %253  ;;  %v244_v29 = vpop.permute.xlu0 %243 }
  0xd6   : > { %v257_v31 = vsel %vm255_vm3, %v252_v22, %v254_v28  ;;  %v247_v32 = vsel %vm245_vm4, %v242_v19, %v244_v29  ;;  %v319_v33 = vsel %vm313_vm6, %v312_v27, %v244_v29  ;;  %v453_v19 = vsub.s32 0, %v918_v3 }
  0xd7   : > { %v328_v36 = vsel %vm320_vm5, %v319_v33, %v254_v28  ;;  %v317_v37 = vsel %vm313_vm6, %v309_v30, %v247_v32 }
  0xd8   : > { %580 = vmatpush3.bf16.msra.mxu1 %v328_v36  ;;  %v325_v38 = vsel %vm320_vm5, %v317_v37, %v257_v31 }
  0xd9   : > { %v261_v39 = vpop.permute.xlu1 %260  ;;  %368 = vmatprep.subr.bf16.mxu0 %v325_v38  ;;  %v250_v40 = vpop.permute.xlu0 %249  ;;  %581 = vmatprep.subr.bf16.mxu1 %v759_v11 }
  0xda   : > { %v256_v41 = vsel %vm255_vm3, %v250_v40, %v252_v22  ;;  %v454_v22 = vrot.slane %v449_v18, %v453_v19 }
  0xdb   : > { %v322_v43 = vsel %vm320_vm5, %v315_v42, %v256_v41 }
  0xdc   : > { %369 = vmatpush1.bf16.msra.mxu0 %v322_v43 }
  0xdd   : > { %v270_v44 = vpop.permute.xlu1 %269  ;;  %v263_v45 = vpop.permute.xlu0 %262 }
  0xde   : > { %v266_v54 = vsel %vm264_vm9, %v261_v39, %v263_v45 }
  0xe1   : > { %v259_v46 = vpop.permute.xlu1 %258  ;;  %v272_v47 = vpop.permute.xlu0 %271 }
  0xe2   : > { %v275_v52 = vsel %vm273_vm7, %v270_v44, %v272_v47  ;;  %v338_v55 = vsel %vm303_vm2, %v263_v45, %v272_v47  ;;  %v265_v2 = vsel %vm264_vm9, %v259_v46, %v261_v39 }
  0xe3   : > { %v335_v56 = vsel %vm303_vm2, %v266_v54, %v275_v52 }
  0xe5   : > { %v279_v48 = vpop.permute.xlu1 %278  ;;  %v268_v49 = vpop.permute.xlu0 %267 }
  0xe6   : > { %v274_v60 = vsel %vm273_vm7, %v268_v49, %v270_v44 }
  0xe7   : > { %v332_v4 = vsel %vm303_vm2, %v265_v2, %v274_v60 }
  0xe9   : > { %v277_v50 = vpop.permute.xlu1 %276  ;;  %v281_v51 = vpop.permute.xlu0 %280 }
  0xea   : > { %v284_v53 = vsel %vm282_vm8, %v279_v48, %v281_v51  ;;  %v344_v57 = vsel %vm313_vm6, %v338_v55, %v281_v51  ;;  %v283_v0 = vsel %vm282_vm8, %v277_v50, %v279_v48 }
  0xeb   : > { %v342_v63 = vsel %vm313_vm6, %v335_v56, %v284_v53  ;;  %v340_v8 = vsel %vm313_vm6, %v332_v4, %v283_v0 }
  0xed   : > { %v290_v58 = vpop.permute.xlu1 %289  ;;  %v288_v59 = vpop.permute.xlu0 %287 }
  0xee   : > { %v293_v61 = vsel %vm291_vm10, %v288_v59, %v290_v58  ;;  %v352_v62 = vsel %vm320_vm5, %v344_v57, %v290_v58 }
  0xef   : > { %582 = vmatpush3.bf16.msra.mxu1 %v352_v62  ;;  %v349_v1 = vsel %vm320_vm5, %v342_v63, %v293_v61 }
  0xf0   : > { %370 = vmatprep.subr.bf16.mxu0 %v349_v1  ;;  %583 = vmatprep.subr.bf16.mxu1 %v759_v11 }
  0xf1   : > { %v295_v5 = vpop.permute.xlu1 %294  ;;  %v286_v6 = vpop.permute.xlu0 %285 }
  0xf2   : > { %v292_v7 = vsel %vm291_vm10, %v286_v6, %v288_v59 }
  0xf3   : > { %v346_v9 = vsel %vm320_vm5, %v340_v8, %v292_v7 }
  0xf4   : > { %371 = vmatpush1.bf16.msra.mxu0 %v346_v9 }
  0xf5   : > { %v299_v10 = vpop.permute.xlu1 %298  ;;  %v297_v12 = vpop.permute.xlu0 %296 }
  0xf6   : > { %v301_v13 = vsel %vm300_vm11, %v295_v5, %v297_v12  ;;  %v302_v14 = vsel %vm300_vm11, %v297_v12, %v299_v10  ;;  %v366_v15 = vsel %vm303_vm2, %v299_v10, 0 }
  0xf7   : > { %570 = vmatprep.subr.msk.bf16.mxu0 %vm303_vm2, %v302_v14  ;;  %584 = vmatpush3.bf16.msra.mxu1 %v366_v15  ;;  %v360_v11 = vsel %vm303_vm2, %v301_v13, 0 }
  0xf8   : > { %373 = vmatpush1.bf16.msra.mxu0 %v360_v11 }
  0xfa   : > { %586 = vmatmul.mubr.msk.bf16.vlgmr.msra.gmra.mrb[0].mxu1 %vm355_vm12, %v354_v16 }
  0xfb   : > { %571 = vmatmul.mubr.msk.bf16.vlgmr.msra.gmra.mrb[0].mxu0 %vm355_vm12, %v354_v16 }
 0x1cd   : > { %v443_v24 = vpop.f32.mrb[0].mxu1 }
 0x1ce   : > { %v468_v25 = vmul.f32 %v462_v21, %v443_v24  ;;  %v402_v26 = vpop.f32.mrb[0].mxu0  ;;  %v587_v27 = vpop.f32.mrb[1].mxu1 }
 0x1cf   : > { %v466_v28 = vmul.f32 %v454_v22, %v402_v26  ;;  %v404_v29 = vpop.f32.mrb[1].mxu0  ;;  %v446_v30 = vpop.f32.mrb[2].mxu1 }
 0x1d0   : > { %v467_v31 = vmul.f32 %v458_v23, %v404_v29  ;;  %v406_v32 = vpop.f32.mrb[2].mxu0  ;;  %v588_v33 = vpop.f32.mrb[3].mxu1  ;;  %v477_v34 = vmul.f32 %v468_v25, %v443_v24  ;;  %v471_v3 = vsel %vm470_vm13, %v468_v25, 0.0 }
 0x1d1   : > { %v475_v35 = vmul.f32 %v466_v28, %v402_v26  ;;  %v407_v36 = vpop.f32.mrb[3].mxu0 }
 0x1d2   : > { %v476_v37 = vmul.f32 %v467_v31, %v404_v29  ;;  %v469_v38 = vadd.f32 %v467_v31, %v466_v28  ;;  %v479_v41 = vsel %vm470_vm13, %v477_v34, 0.0 }
 0x1d4   : > { %v472_v39 = vadd.f32 %v471_v3, %v469_v38  ;;  %v478_v40 = vadd.f32 %v476_v37, %v475_v35 }
 0x1d6   : > { %473 = vadd.xlane.f32.xlu0 %v472_v39  ;;  %v480_v42 = vadd.f32 %v479_v41, %v478_v40 }
 0x1d8   : > { %481 = vadd.xlane.f32.xlu1 %v480_v42 }
 0x263   : > { %v474_v43 = vpop.xlane.xlu0 %473 }
 0x265   : > { %v482_v44 = vpop.xlane.xlu1 %481 }
 0x266   : > { %v484_v45 = vsel %vm483_vm14, %v474_v43, %v482_v44 }
 0x267   : > { %486 = vst.msk [vmem:[%s199_s4] sm:$0xff] %vm485_vm15, %v484_v45 }
 0x268 PF: > { %p14_p10 = scmp.ge.s32.totalorder %s826_s21, 4   ;;  %s1009_s12 = smov %s744_s13 }
 0x269   : > { %s1010_s13 = smov %s748_s14  ;;  %s1011_s14 = smov %s862_s9 }
 0x26a   : > { %s1012_s15 = smov %s826_s21  ;;  %16 = sbr.rel (!%p14_p10) target bundleno = 4 (0x4), region = 76 }
 0x271   :  { %506 = vsyncpa [#allocation3], 1 }
 0x272   :  { %508 = vsyncpa [#allocation3 + $0x1], 1 }
 0x273   :  { %509 = vsyncpa [#allocation5], 1 }

</bundles_post_ra>
